<compile_context>
chip_gen: v7x
topology: tpu7x:2x2x1
jax: 0.10.0
libtpu: 0.0.40
codegen_flags: <defaults>
</compile_context>

<pallas_src>
import functools

import jax
import jax.numpy as jnp
from jax import lax
from jax.experimental import pallas as pl
from jax.experimental.pallas import tpu as pltpu


def _round_up(x, m):
    return (x + m - 1) // m * m


def _choose_batch_tile(B, tile_b):
    """Batch tile: multiple of 128, capped at 8192 (v7x VMEM headroom);
    prefers an even grid-step count when the batch spans multiple tiles
    (v7x megacore: 2 TensorCores share the 'parallel' batch axis)."""
    b_pad = _round_up(B, 128)
    tb = min(_round_up(max(tile_b, 128), 128), b_pad, 8192)
    steps = pl.cdiv(B, tb)
    if steps > 1 and steps % 2 == 1:
        tb_even = min(_round_up(pl.cdiv(b_pad, steps + 1), 128), tb)
        if pl.cdiv(B, tb_even) % 2 == 0:
            tb = tb_even
            steps = pl.cdiv(B, tb)
    return tb, steps


def value_mlp_kernel(x_ref, w1_ref, b1_ref, w2_ref, b2_ref, w3_ref, b3_ref,
                     o_ref, *, compute_dtype, epilogue_dtype):
    """One batch tile.

    x: (TB, S) f32, w1: (H, S) / w2: (H, H) in compute_dtype,
    b1/b2/w3: (H, 1) f32, b3: (1, 1) f32 in SMEM, o: (1, TB) f32.
    """
    # Cast the state tile to the MXU compute dtype after the VMEM load; this
    # keeps the wrapper free of a full-batch HBM cast pass.
    x = x_ref[...].astype(compute_dtype)                              # (TB, S)

    # fc1: h1[h, b] = sum_s w1[h, s] * x[b, s]  -> (H, TB), f32 accumulation.
    h1 = lax.dot_general(
        w1_ref[...], x,
        dimension_numbers=(((1,), (1,)), ((), ())),
        preferred_element_type=jnp.float32)
    h1 = jnp.maximum(h1.astype(epilogue_dtype)
                     + b1_ref[...].astype(epilogue_dtype), 0.0)

    # fc2: (H, H) @ (H, TB) -> (H, TB), f32 accumulation.
    h2 = jnp.dot(w2_ref[...], h1.astype(compute_dtype),
                 preferred_element_type=jnp.float32)
    h2 = jnp.maximum(h2 + b2_ref[...], 0.0)                           # f32 VPU

    # fc3 (out_features == 1): VPU multiply + XLU sublane reduction.
    out = jnp.sum(h2 * w3_ref[...], axis=0, keepdims=True)            # (1, TB)
    out = out + b3_ref[0, 0]                                          # SMEM scalar
    o_ref[...] = out.astype(o_ref.dtype)


def value_forward(state, params, *, tile_b=2048,
                  compute_dtype=jnp.bfloat16,
                  epilogue_dtype=jnp.float32):
    """state: (B, state_size) f32 -> (B, 1) f32.

    compute_dtype: dtype of the MXU operands (x, W1, W2); accumulation is f32.
    epilogue_dtype: dtype of the fc1 bias+ReLU epilogue; keep f32 on v5e
        (no bf16 VPU), bf16 is cheaper on v6e/v7x.
    """
    w1, b1, w2, b2, w3, b3 = params
    B, S = state.shape
    H = w1.shape[0]

    tb, num_tiles = _choose_batch_tile(B, tile_b)

    # Only the tiny weight matrices are cast in the wrapper; the (large) state
    # is cast inside the kernel and ragged batches are handled by Pallas'
    # partial-block masking (no jnp.pad / astype HBM passes over the batch).
    w1c = w1.astype(compute_dtype)
    w2c = w2.astype(compute_dtype)

    kernel = functools.partial(value_mlp_kernel,
                               compute_dtype=compute_dtype,
                               epilogue_dtype=epilogue_dtype)

    out_row = pl.pallas_call(
        kernel,
        grid=(num_tiles,),
        in_specs=[
            pl.BlockSpec((tb, S), lambda i: (i, 0)),             # state tile
            pl.BlockSpec((H, S), lambda i: (0, 0)),              # W1 (resident)
            pl.BlockSpec((H, 1), lambda i: (0, 0)),              # b1 (resident)
            pl.BlockSpec((H, H), lambda i: (0, 0)),              # W2 (resident)
            pl.BlockSpec((H, 1), lambda i: (0, 0)),              # b2 (resident)
            pl.BlockSpec((H, 1), lambda i: (0, 0)),              # w3 (resident)
            pl.BlockSpec(memory_space=pltpu.MemorySpace.SMEM),   # b3 scalar
        ],
        out_specs=pl.BlockSpec((1, tb), lambda i: (0, i)),       # lane-dense row
        out_shape=jax.ShapeDtypeStruct((1, B), jnp.float32),
        compiler_params=pltpu.CompilerParams(
            dimension_semantics=("parallel",)),                  # megacore on v7x
    )(state, w1c, b1, w2c, b2, w3, b3)

    return out_row.reshape(B, 1)


def init_params(key, state_size, hidden_size=64):
    """PyTorch-layout params: W:(out,in), biases as columns, b3 as (1,1)."""
    ks = jax.random.split(key, 6)

    def linear(kw, kb, fan_in, fan_out):
        bound = 1.0 / jnp.sqrt(jnp.float32(fan_in))
        w = jax.random.uniform(kw, (fan_out, fan_in), jnp.float32, -bound, bound)
        b = jax.random.uniform(kb, (fan_out, 1), jnp.float32, -bound, bound)
        return w, b

    w1, b1 = linear(ks[0], ks[1], state_size, hidden_size)
    w2, b2 = linear(ks[2], ks[3], hidden_size, hidden_size)
    w3, b3t = linear(ks[4], ks[5], hidden_size, 1)   # w3: (1, H), b3t: (1, 1)
    return (w1, b1, w2, b2, w3.T, b3t)               # store w3 as (H, 1) column


def value_reference(state, params):
    """Pure-JAX reference (full-precision matmuls) for correctness checks."""
    w1, b1, w2, b2, w3, b3 = params
    hp = lax.Precision.HIGHEST
    h1 = jnp.maximum(jnp.dot(state, w1.T, precision=hp) + b1[:, 0], 0.0)
    h2 = jnp.maximum(jnp.dot(h1, w2.T, precision=hp) + b2[:, 0], 0.0)
    return jnp.dot(h2, w3, precision=hp) + b3[0, 0]


if __name__ == "__main__":
    key = jax.random.PRNGKey(0)
    k_params, k_small, k_big = jax.random.split(key, 3)

    state_size, hidden_size = 16, 64
    params = init_params(k_params, state_size, hidden_size)

    # 1) Small batch, defaults (bf16 MXU operands, single partial tile).
    state_small = jax.random.normal(k_small, (8, state_size), jnp.float32)
    out_small = jax.block_until_ready(value_forward(state_small, params))
    ref_small = value_reference(state_small, params)
    assert out_small.shape == (8, 1)
    assert jnp.allclose(out_small, ref_small, atol=1e-1, rtol=1e-1)

    # 2) Ragged batch, multi-step grid, full-f32 path (tight tolerance).
    state_big = jax.random.normal(k_big, (300, state_size), jnp.float32)
    ref_big = value_reference(state_big, params)
    out_f32 = jax.block_until_ready(
        value_forward(state_big, params, tile_b=128,
                      compute_dtype=jnp.float32))
    assert out_f32.shape == (300, 1)
    assert jnp.allclose(out_f32, ref_big, atol=1e-4, rtol=1e-4)

    # 3) Ragged batch, defaults (bf16 MXU operands, one big partial tile).
    out_bf16 = jax.block_until_ready(value_forward(state_big, params))
    assert out_bf16.shape == (300, 1)
    assert jnp.allclose(out_bf16, ref_big, atol=1e-1, rtol=1e-1)

    print("KERNEL_OK")
</pallas_src>

<mosaic_0001>
module attributes {stable_mosaic.version = 11 : i64} {
  func.func @value_mlp_kernel(%arg0: i32, %arg1: memref<128x16xf32, #tpu.memory_space<vmem>>, %arg2: memref<64x16xbf16, #tpu.memory_space<vmem>>, %arg3: memref<64x1xf32, #tpu.memory_space<vmem>>, %arg4: memref<64x64xbf16, #tpu.memory_space<vmem>>, %arg5: memref<64x1xf32, #tpu.memory_space<vmem>>, %arg6: memref<64x1xf32, #tpu.memory_space<vmem>>, %arg7: memref<1x1xf32, #tpu.memory_space<smem>>, %arg8: memref<1x128xf32, #tpu.memory_space<vmem>>) attributes {dimension_semantics = [#tpu.dimension_semantics<parallel>], iteration_bounds = array<i64: 1>, scalar_prefetch = 0 : i64, scratch_operands = 0 : i64, tpu.core_type = #tpu.core_type<tc>, window_params = [{transform_indices = @transform_0, window_bounds = array<i64: 128, 16>}, {pipeline_mode = #tpu.pipeline_mode<synchronous>, transform_indices = @transform_1, window_bounds = array<i64: 64, 16>}, {pipeline_mode = #tpu.pipeline_mode<synchronous>, transform_indices = @transform_2, window_bounds = array<i64: 64, 1>}, {pipeline_mode = #tpu.pipeline_mode<synchronous>, transform_indices = @transform_3, window_bounds = array<i64: 64, 64>}, {pipeline_mode = #tpu.pipeline_mode<synchronous>, transform_indices = @transform_4, window_bounds = array<i64: 64, 1>}, {pipeline_mode = #tpu.pipeline_mode<synchronous>, transform_indices = @transform_5, window_bounds = array<i64: 64, 1>}, {transform_indices = @transform_6, window_bounds = array<i64: 1, 1>}, {transform_indices = @transform_7, window_bounds = array<i64: 1, 128>}]} {
    %c0 = arith.constant 0 : index
    %c0_0 = arith.constant 0 : index
    %0 = vector.load %arg1[%c0, %c0_0] : memref<128x16xf32, #tpu.memory_space<vmem>>, vector<128x16xf32>
    %1 = arith.truncf %0 : vector<128x16xf32> to vector<128x16xbf16>
    %c0_1 = arith.constant 0 : index
    %c0_2 = arith.constant 0 : index
    %2 = vector.load %arg2[%c0_1, %c0_2] : memref<64x16xbf16, #tpu.memory_space<vmem>>, vector<64x16xbf16>
    %cst = arith.constant dense<0.000000e+00> : vector<64x128xf32>
    %3 = tpu.matmul %2, %1, %cst {dimension_numbers = #tpu.dot_dimension_numbers<[1], [1], [0], [0], [0, 0, 1, 0], [], []>} : vector<64x16xbf16>, vector<128x16xbf16>, vector<64x128xf32> -> vector<64x128xf32>
    %c0_3 = arith.constant 0 : index
    %c0_4 = arith.constant 0 : index
    %4 = vector.load %arg3[%c0_3, %c0_4] : memref<64x1xf32, #tpu.memory_space<vmem>>, vector<64x1xf32>
    %5 = vector.broadcast %4 : vector<64x1xf32> to vector<64x128xf32>
    %6 = arith.addf %3, %5 : vector<64x128xf32>
    %cst_5 = arith.constant 0.000000e+00 : f32
    %7 = vector.broadcast %cst_5 : f32 to vector<64x128xf32>
    %8 = arith.maximumf %6, %7 : vector<64x128xf32>
    %c0_6 = arith.constant 0 : index
    %c0_7 = arith.constant 0 : index
    %9 = vector.load %arg4[%c0_6, %c0_7] : memref<64x64xbf16, #tpu.memory_space<vmem>>, vector<64x64xbf16>
    %10 = arith.truncf %8 : vector<64x128xf32> to vector<64x128xbf16>
    %cst_8 = arith.constant dense<0.000000e+00> : vector<64x128xf32>
    %11 = tpu.matmul %9, %10, %cst_8 {dimension_numbers = #tpu.dot_dimension_numbers<[1], [0], [0], [1], [0, 0, 1, 1], [], []>} : vector<64x64xbf16>, vector<64x128xbf16>, vector<64x128xf32> -> vector<64x128xf32>
    %c0_9 = arith.constant 0 : index
    %c0_10 = arith.constant 0 : index
    %12 = vector.load %arg5[%c0_9, %c0_10] : memref<64x1xf32, #tpu.memory_space<vmem>>, vector<64x1xf32>
    %13 = vector.broadcast %12 : vector<64x1xf32> to vector<64x128xf32>
    %14 = arith.addf %11, %13 : vector<64x128xf32>
    %cst_11 = arith.constant 0.000000e+00 : f32
    %15 = vector.broadcast %cst_11 : f32 to vector<64x128xf32>
    %16 = arith.maximumf %14, %15 : vector<64x128xf32>
    %c0_12 = arith.constant 0 : index
    %c0_13 = arith.constant 0 : index
    %17 = vector.load %arg6[%c0_12, %c0_13] : memref<64x1xf32, #tpu.memory_space<vmem>>, vector<64x1xf32>
    %18 = vector.broadcast %17 : vector<64x1xf32> to vector<64x128xf32>
    %19 = arith.mulf %16, %18 : vector<64x128xf32>
    %cst_14 = arith.constant dense<0.000000e+00> : vector<128xf32>
    %20 = vector.multi_reduction <add>, %19, %cst_14 [0] : vector<64x128xf32> to vector<128xf32>
    %21 = vector.shape_cast %20 : vector<128xf32> to vector<1x128xf32>
    %c0_15 = arith.constant 0 : index
    %c0_16 = arith.constant 0 : index
    %22 = memref.load %arg7[%c0_15, %c0_16] : memref<1x1xf32, #tpu.memory_space<smem>>
    %23 = vector.broadcast %22 : f32 to vector<1x128xf32>
    %24 = arith.addf %21, %23 : vector<1x128xf32>
    %c0_17 = arith.constant 0 : index
    %c0_18 = arith.constant 0 : index
    %25 = vector.load %arg8[%c0_17, %c0_18] : memref<1x128xf32, #tpu.memory_space<vmem>>, vector<1x128xf32>
    tpu.vector_store %arg8[%c0_17, %c0_18], %24 {strides = array<i32>} : memref<1x128xf32, #tpu.memory_space<vmem>>, vector<1x128xf32>,
    return
  }
  func.func @transform_0(%arg0: i32) -> (i32, i32) {
    %c0_i32 = arith.constant 0 : i32
    %c0_i32_0 = arith.constant 0 : i32
    return %arg0, %c0_i32 : i32, i32
  }
  func.func @transform_1(%arg0: i32) -> (i32, i32) {
    %c0_i32 = arith.constant 0 : i32
    %c0_i32_0 = arith.constant 0 : i32
    %c0_i32_1 = arith.constant 0 : i32
    return %c0_i32, %c0_i32_0 : i32, i32
  }
  func.func @transform_2(%arg0: i32) -> (i32, i32) {
    %c0_i32 = arith.constant 0 : i32
    %c0_i32_0 = arith.constant 0 : i32
    %c0_i32_1 = arith.constant 0 : i32
    return %c0_i32, %c0_i32_0 : i32, i32
  }
  func.func @transform_3(%arg0: i32) -> (i32, i32) {
    %c0_i32 = arith.constant 0 : i32
    %c0_i32_0 = arith.constant 0 : i32
    %c0_i32_1 = arith.constant 0 : i32
    return %c0_i32, %c0_i32_0 : i32, i32
  }
  func.func @transform_4(%arg0: i32) -> (i32, i32) {
    %c0_i32 = arith.constant 0 : i32
    %c0_i32_0 = arith.constant 0 : i32
    %c0_i32_1 = arith.constant 0 : i32
    return %c0_i32, %c0_i32_0 : i32, i32
  }
  func.func @transform_5(%arg0: i32) -> (i32, i32) {
    %c0_i32 = arith.constant 0 : i32
    %c0_i32_0 = arith.constant 0 : i32
    %c0_i32_1 = arith.constant 0 : i32
    return %c0_i32, %c0_i32_0 : i32, i32
  }
  func.func @transform_6(%arg0: i32) -> (i32, i32) {
    %c0_i32 = arith.constant 0 : i32
    %c0_i32_0 = arith.constant 0 : i32
    %c0_i32_1 = arith.constant 0 : i32
    return %c0_i32, %c0_i32_0 : i32, i32
  }
  func.func @transform_7(%arg0: i32) -> (i32, i32) {
    %c0_i32 = arith.constant 0 : i32
    %c0_i32_0 = arith.constant 0 : i32
    return %c0_i32, %arg0 : i32, i32
  }
}

</mosaic_0001>

<bundles_post_ra>
// kernel: tpu_custom_call.1
= control target key start
LH: loop header
LB: loop body
LE: loop exit
PB: predicated region body
PF: predicated region fallthrough
CT: control target
= control target key end

     0   :  { %vm129_vm0 = vcmask 130048   ;;  %v612_v5 = vmov 0   ;;  %s837_s0 = inlined_call_operand.vmem [shape: f32[8,16], index: 0, kind: input, shape index: {}]   ;;  %s838_s1 = inlined_call_operand.vmem [shape: bf16[64,16], index: 1, kind: input, shape index: {}]   ;;  %s839_s2 = inlined_call_operand.vmem [shape: f32[64,1], index: 2, kind: input, shape index: {}]   ;;  %s840_s3 = inlined_call_operand.vmem [shape: bf16[64,64], index: 3, kind: input, shape index: {}]   ;;  %s841_s4 = inlined_call_operand.vmem [shape: f32[64,1], index: 4, kind: input, shape index: {}]   ;;  %s842_s5 = inlined_call_operand.vmem [shape: f32[64,1], index: 5, kind: input, shape index: {}]   ;;  %s843_s6 = inlined_call_operand.<no memory space> [shape: f32[1,1], index: 6, kind: input, shape index: {}]   ;;  %s844_s7 = inlined_call_operand.hbm [shape: f32[1,8], index: 7, kind: output, shape index: {}]  }
   0x1   :  { %v29_v0 = vld [vmem:[%s837_s0] sm:$0xff]  ;;  %v30_v1 = vld [vmem:[%s837_s0 + $0x8] sm:$0xff]  ;;  %v31_v2 = vld [vmem:[%s837_s0 + $0x10] sm:$0xff]  ;;  %578 = vset.pattern.permute.xlu0 %v612_v5  ;;  %579 = vset.pattern.permute.xlu1 %v612_v5 }
   0x2   :  { %v45_v3 = vpack.c.bf16 %v30_v1, %v29_v0  ;;  %v32_v4 = vld [vmem:[%s837_s0 + $0x18] sm:$0xff]  ;;  %v33_v8 = vld [vmem:[%s837_s0 + $0x20] sm:$0xff]  ;;  %v34_v9 = vld [vmem:[%s837_s0 + $0x28] sm:$0xff] }
   0x3   :  { %v46_v6 = vpack.c.bf16 %v32_v4, %v31_v2  ;;  %v580_v10 = vld [vmem:[%s838_s1] sm:$0xff]   ;;  %v47_v12 = vpack.c.bf16 %v34_v9, %v33_v8  ;;  %v63_v14 = vld [vmem:[%s839_s2 + $0x10] sm:$0xff]  ;;  %v62_v15 = vld [vmem:[%s839_s2 + $0x8] sm:$0xff] }
   0x4   :  { %568 = vmatprep.subr.msk.bf16.mxu0 %vm129_vm0, %v45_v3  ;;  %v143_v7 = vsel %vm129_vm0, %v45_v3, 0  ;;  %544 = vmatprep.mubr.msk.bf16.mxu0 %vm129_vm0, %v580_v10  ;;  %v61_v13 = vld [vmem:[%s839_s2] sm:$0xff]  ;;  %v64_v16 = vld [vmem:[%s839_s2 + $0x18] sm:$0xff]  ;;  %v35_v17 = vld [vmem:[%s837_s0 + $0x30] sm:$0xff] }
   0x5   :  { %529 = vmatpush3.bf16.xpose.msra.mxu0 %v143_v7  ;;  %v146_v11 = vsel %vm129_vm0, %v46_v6, 0  ;;  %71 = vperm.xlu0 %578, %v61_v13   ;;  %v36_v18 = vld [vmem:[%s837_s0 + $0x38] sm:$0xff]  ;;  %v65_v19 = vld [vmem:[%s839_s2 + $0x20] sm:$0xff]  ;;  %v66_v20 = vld [vmem:[%s839_s2 + $0x28] sm:$0xff]  ;;  %v149_v21 = vsel %vm129_vm0, %v47_v12, 0 }
   0x6   :  { %569 = vmatprep.subr.msk.bf16.mxu0 %vm129_vm0, %v46_v6  ;;  %81 = vperm.xlu1 %579, %v63_v14   ;;  %v48_v22 = vpack.c.bf16 %v36_v18, %v35_v17  ;;  %v67_v23 = vld [vmem:[%s839_s2 + $0x30] sm:$0xff]  ;;  %v68_v24 = vld [vmem:[%s839_s2 + $0x38] sm:$0xff] }
   0x9   :  { %76 = vperm.xlu0 %578, %v62_v15  }
   0xa   :  { %86 = vperm.xlu1 %579, %v64_v16  }
   0xd   :  { %531 = vmatpush3.bf16.xpose.msra.mxu0 %v146_v11  ;;  %91 = vperm.xlu0 %578, %v65_v19  }
   0xe   :  { %570 = vmatprep.subr.msk.bf16.mxu0 %vm129_vm0, %v47_v12  ;;  %96 = vperm.xlu1 %579, %v66_v20  }
  0x15   :  { %533 = vmatpush3.bf16.xpose.msra.mxu0 %v149_v21 }
  0x16   :  { %13 = vsyncpa [#allocation4], 0  ;;  %571 = vmatprep.subr.msk.bf16.mxu0 %vm129_vm0, %v48_v22  ;;  %v37_v25 = vld [vmem:[%s837_s0 + $0x40] sm:$0xff]  ;;  %v38_v26 = vld [vmem:[%s837_s0 + $0x48] sm:$0xff]  ;;  %101 = vperm.xlu0 %578, %v67_v23   ;;  %v152_v29 = vsel %vm129_vm0, %v48_v22, 0  ;;  %vm319_vm1 = vcmask 523264  }
  0x17   :  { %106 = vperm.xlu1 %579, %v68_v24   ;;  %v251_v27 = vld [vmem:[%s841_s4] sm:$0xff]  ;;  %v252_v28 = vld [vmem:[%s841_s4 + $0x8] sm:$0xff]  ;;  %v49_v30 = vpack.c.bf16 %v38_v26, %v37_v25  ;;  %v253_v31 = vld [vmem:[%s841_s4 + $0x10] sm:$0xff]  ;;  %s613_s22 = smov [#allocation3]  }
  0x18   :  { %v254_v32 = vld [vmem:[%s841_s4 + $0x18] sm:$0xff]  ;;  %v39_v33 = vld [vmem:[%s837_s0 + $0x50] sm:$0xff]  ;;  %v405_v35 = vld [vmem:[%s842_s5] sm:$0xff]  ;;  %s484_s23 = sshll.u32 %s613_s22, 4  ;;  %s485_s23 = int_to_ptr.vmem [resolvable:$true] %s484_s23 }
  0x19   :  { %v40_v34 = vld [vmem:[%s837_s0 + $0x58] sm:$0xff]  ;;  %v406_v36 = vld [vmem:[%s842_s5 + $0x8] sm:$0xff]  ;;  %v155_v37 = vsel %vm129_vm0, %v49_v30, 0  ;;  %v255_v39 = vld [vmem:[%s841_s4 + $0x20] sm:$0xff]  ;;  %s588_s24 = scalar_lea.vmem %s485_s23, 16  ;;  %s592_s25 = scalar_lea.vmem %s485_s23, 32 }
  0x1a   :  { %261 = vperm.xlu0 %578, %v251_v27   ;;  %v50_v38 = vpack.c.bf16 %v40_v34, %v39_v33  ;;  %v407_v40 = vld [vmem:[%s842_s5 + $0x10] sm:$0xff]  ;;  %v41_v41 = vld [vmem:[%s837_s0 + $0x60] sm:$0xff]  ;;  %v42_v42 = vld [vmem:[%s837_s0 + $0x68] sm:$0xff]  ;;  %p589_p0 = scmp.ne.s32.totalorder %s485_s23, %s588_s24  ;;  %p593_p1 = scmp.lt.s32.totalorder %s485_s23, %s485_s23 }
  0x1b   :  { %266 = vperm.xlu1 %579, %v252_v28   ;;  %v256_v43 = vld [vmem:[%s841_s4 + $0x28] sm:$0xff]  ;;  %v408_v44 = vld [vmem:[%s842_s5 + $0x18] sm:$0xff]  ;;  %v51_v46 = vpack.c.bf16 %v42_v42, %v41_v41  ;;  %v257_v47 = vld [vmem:[%s841_s4 + $0x30] sm:$0xff]  ;;  %p594_p2 = scmp.lt.s32.totalorder %s592_s25, %s588_s24 }
  0x1c   :  { %v158_v45 = vsel %vm129_vm0, %v50_v38, 0  ;;  %v409_v48 = vld [vmem:[%s842_s5 + $0x20] sm:$0xff]  ;;  %v43_v49 = vld [vmem:[%s837_s0 + $0x70] sm:$0xff]  ;;  %v44_v50 = vld [vmem:[%s837_s0 + $0x78] sm:$0xff] }
  0x1d   :  { %535 = vmatpush3.bf16.xpose.msra.mxu0 %v152_v29  ;;  %v258_v51 = vld [vmem:[%s841_s4 + $0x38] sm:$0xff]  ;;  %v410_v52 = vld [vmem:[%s842_s5 + $0x28] sm:$0xff]  ;;  %v161_v53 = vsel %vm129_vm0, %v51_v46, 0  ;;  %v52_v54 = vpack.c.bf16 %v44_v50, %v43_v49  ;;  %v411_v55 = vld [vmem:[%s842_s5 + $0x30] sm:$0xff]  ;;  %p595_p3 = por %p594_p2, %p593_p1 }
  0x1e   :  { %572 = vmatprep.subr.msk.bf16.mxu0 %vm129_vm0, %v49_v30  ;;  %271 = vperm.xlu0 %578, %v253_v31   ;;  %v412_v56 = vld [vmem:[%s842_s5 + $0x38] sm:$0xff]  ;;  %v581_v58 = vld [vmem:[%s838_s1 + $0x8] sm:$0xff]   ;;  %v582_v59 = vld [vmem:[%s838_s1 + $0x10] sm:$0xff]  }
  0x1f   :  { %276 = vperm.xlu1 %579, %v254_v32   ;;  %v164_v57 = vsel %vm129_vm0, %v52_v54, 0  ;;  %v583_v60 = vld [vmem:[%s838_s1 + $0x18] sm:$0xff]   ;;  %v584_v61 = vld [vmem:[%s840_s3] sm:$0xff]   ;;  %v585_v34 = vld [vmem:[%s840_s3 + $0x8] sm:$0xff]   ;;  %p596_p4 = pnand %p595_p3, %p589_p0 }
  0x20   :  { %560 = vmatprep.mubr.msk.bf16.mxu1 %vm319_vm1, %v584_v61 }
  0x22   :  { %415 = vperm.xlu0 %578, %v405_v35   ;;  %v586_v35 = vld [vmem:[%s840_s3 + $0x10] sm:$0xff]  }
  0x23   :  { %420 = vperm.xlu1 %579, %v406_v36   ;;  %v587_v36 = vld [vmem:[%s840_s3 + $0x18] sm:$0xff]  }
  0x25   :  { %537 = vmatpush3.bf16.xpose.msra.mxu0 %v155_v37 }
  0x26   :  { %573 = vmatprep.subr.msk.bf16.mxu0 %vm129_vm0, %v50_v38  ;;  %281 = vperm.xlu0 %578, %v255_v39  }
  0x27   :  { %425 = vperm.xlu1 %579, %v407_v40  }
  0x2a   :  { %286 = vperm.xlu0 %578, %v256_v43  }
  0x2b   :  { %430 = vperm.xlu1 %579, %v408_v44  }
  0x2d   :  { %539 = vmatpush3.bf16.xpose.msra.mxu0 %v158_v45 }
  0x2e   :  { %574 = vmatprep.subr.msk.bf16.mxu0 %vm129_vm0, %v51_v46  ;;  %291 = vperm.xlu0 %578, %v257_v47  }
  0x2f   :  { %435 = vperm.xlu1 %579, %v409_v48  }
  0x32   :  { %296 = vperm.xlu0 %578, %v258_v51  }
  0x33   :  { %440 = vperm.xlu1 %579, %v410_v52  }
  0x35   :  { %541 = vmatpush3.bf16.xpose.msra.mxu0 %v161_v53 }
  0x36   :  { %575 = vmatprep.subr.msk.bf16.mxu0 %vm129_vm0, %v52_v54  ;;  %445 = vperm.xlu0 %578, %v411_v55  }
  0x37   :  { %450 = vperm.xlu1 %579, %v412_v56  }
  0x3d   :  { %543 = vmatpush3.bf16.xpose.msra.mxu0 %v164_v57 }
  0x44   :  { %545 = vmatmul.mubr.msk.bf16.vlgmr.msra.gmra.mrb[0].mxu0 %vm129_vm0, %v581_v58 }
  0x45   :  { %548 = vmatprep.mubr.msk.bf16.mxu0 %vm129_vm0, %v582_v59 }
  0x4c   :  { %549 = vmatmul.mubr.msk.bf16.gmra.mrb[4].mxu0 %vm129_vm0, %v583_v60 }
  0x84   :  { %v72_v62 = vpop.permute.xlu0 %71 }
  0x85   :  { %v82_v63 = vpop.permute.xlu1 %81 }
  0x88   :  { %v77_v0 = vpop.permute.xlu0 %76 }
  0x89   :  { %v87_v1 = vpop.permute.xlu1 %86 }
  0x8c   :  { %v92_v5 = vpop.permute.xlu0 %91 }
  0x8d   :  { %v97_v10 = vpop.permute.xlu1 %96 }
  0x95   :  { %v102_v17 = vpop.permute.xlu0 %101 }
  0x96   :  { %v107_v22 = vpop.permute.xlu1 %106 }
  0x99   :  { %v262_v37 = vpop.permute.xlu0 %261 }
  0x9a   :  { %v267_v38 = vpop.permute.xlu1 %266 }
  0x9d   :  { %v272_v39 = vpop.permute.xlu0 %271 }
  0x9e   :  { %v277_v40 = vpop.permute.xlu1 %276 }
  0xa1   :  { %v416_v41 = vpop.permute.xlu0 %415 }
  0xa2   :  { %v421_v42 = vpop.permute.xlu1 %420 }
  0xa5   :  { %v282_v43 = vpop.permute.xlu0 %281 }
  0xa6   :  { %v426_v44 = vpop.permute.xlu1 %425 }
  0xa9   :  { %v287_v45 = vpop.permute.xlu0 %286 }
  0xaa   :  { %v431_v47 = vpop.permute.xlu1 %430 }
  0xad   :  { %v292_v56 = vpop.permute.xlu0 %291 }
  0xae   :  { %v436_v59 = vpop.permute.xlu1 %435 }
 0x117   :  { %v546_v2 = vpop.f32.mrb[0].mxu0 }
 0x118   :  { %v209_v3 = vadd.f32 %v546_v2, %v82_v63  ;;  %v200_v4 = vpop.f32.mrb[1].mxu0 }
 0x119   :  { %v201_v6 = vadd.f32 %v200_v4, %v72_v62  ;;  %v547_v7 = vpop.f32.mrb[2].mxu0 }
 0x11a   :  { %v212_v8 = vadd.f32 %v547_v7, %v87_v1  ;;  %v203_v9 = vpop.f32.mrb[3].mxu0  ;;  %v233_v12 = vmax.f32 %v209_v3, 0.0 }
 0x11b   :  { %v204_v11 = vadd.f32 %v203_v9, %v77_v0  ;;  %v231_v14 = vmax.f32 %v201_v6, 0.0  ;;  %v297_v6 = vpop.permute.xlu0 %296 }
 0x11c   :  { %v234_v13 = vmax.f32 %v212_v8, 0.0 }
 0x11d   :  { %v232_v15 = vmax.f32 %v204_v11, 0.0 }
 0x11e   :  { %v248_v16 = vpack.c.bf16 %v234_v13, %v233_v12  ;;  %v441_v13 = vpop.permute.xlu1 %440 }
 0x11f   :  { %v550_v18 = vpop.f32.mrb[4].mxu0  ;;  %v247_v19 = vpack.c.bf16 %v232_v15, %v231_v14 }
 0x120   :  { %v225_v20 = vadd.f32 %v550_v18, %v102_v17  ;;  %v216_v21 = vpop.f32.mrb[5].mxu0 }
 0x121   :  { %v217_v23 = vadd.f32 %v216_v21, %v92_v5  ;;  %v551_v24 = vpop.f32.mrb[6].mxu0  ;;  %552 = vmatprep.subr.bf16.mxu1 %v247_v19  ;;  %v446_v21 = vpop.permute.xlu0 %445 }
 0x122   :  { %v228_v25 = vadd.f32 %v551_v24, %v107_v22  ;;  %v219_v26 = vpop.f32.mrb[7].mxu0  ;;  %553 = vmatpush3.bf16.msra.mxu1 %v247_v19  ;;  %v237_v28 = vmax.f32 %v225_v20, 0.0  ;;  %v451_v24 = vpop.permute.xlu1 %450 }
 0x123   :  { %v220_v27 = vadd.f32 %v219_v26, %v97_v10  ;;  %554 = vmatprep.subr.bf16.mxu1 %v248_v16  ;;  %v235_v30 = vmax.f32 %v217_v23, 0.0 }
 0x124   :  { %v238_v29 = vmax.f32 %v228_v25, 0.0 }
 0x125   :  { %v236_v31 = vmax.f32 %v220_v27, 0.0 }
 0x126   :  { %v250_v32 = vpack.c.bf16 %v238_v29, %v237_v28  ;;  %555 = vmatpush3.bf16.msra.mxu1 %v248_v16 }
 0x127   :  { %v249_v33 = vpack.c.bf16 %v236_v31, %v235_v30 }
 0x129   :  { %556 = vmatprep.subr.bf16.mxu1 %v249_v33 }
 0x12a   :  { %557 = vmatpush3.bf16.msra.mxu1 %v249_v33  ;;  %v475_v33 = vstv %s843_s6 }
 0x12b   :  { %558 = vmatprep.subr.bf16.mxu1 %v250_v32 }
 0x12e   :  { %559 = vmatpush3.bf16.msra.mxu1 %v250_v32 }
 0x131   :  { %561 = vmatmul.mubr.msk.bf16.vlgmr.msra.gmra.mrb[0].mxu1 %vm319_vm1, %v585_v34 }
 0x132   :  { %564 = vmatprep.mubr.msk.bf16.mxu1 %vm319_vm1, %v586_v35 }
 0x139   :  { %565 = vmatmul.mubr.msk.bf16.gmra.mrb[4].mxu1 %vm319_vm1, %v587_v36 }
 0x204   :  { %v562_v46 = vpop.f32.mrb[0].mxu1 }
 0x205   :  { %v366_v48 = vpop.f32.mrb[1].mxu1  ;;  %v375_v49 = vadd.f32 %v562_v46, %v272_v39 }
 0x206   :  { %v367_v50 = vadd.f32 %v366_v48, %v262_v37  ;;  %v563_v51 = vpop.f32.mrb[2].mxu1 }
 0x207   :  { %v378_v52 = vadd.f32 %v563_v51, %v277_v40  ;;  %v369_v53 = vpop.f32.mrb[3].mxu1  ;;  %v399_v57 = vmax.f32 %v375_v49, 0.0 }
 0x208   :  { %v397_v54 = vmax.f32 %v367_v50, 0.0  ;;  %v370_v55 = vadd.f32 %v369_v53, %v267_v38 }
 0x209   :  { %v400_v60 = vmax.f32 %v378_v52, 0.0  ;;  %v455_v1 = vmul.f32 %v426_v44, %v399_v57 }
 0x20a   :  { %v398_v58 = vmax.f32 %v370_v55, 0.0  ;;  %v453_v61 = vmul.f32 %v416_v41, %v397_v54 }
 0x20b   :  { %v456_v7 = vmul.f32 %v431_v47, %v400_v60 }
 0x20c   :  { %v454_v62 = vmul.f32 %v421_v42, %v398_v58  ;;  %v566_v63 = vpop.f32.mrb[4].mxu1 }
 0x20d   :  { %v382_v0 = vpop.f32.mrb[5].mxu1  ;;  %v391_v3 = vadd.f32 %v566_v63, %v292_v56 }
 0x20e   :  { %v461_v2 = vadd.f32 %v454_v62, %v453_v61  ;;  %v383_v4 = vadd.f32 %v382_v0, %v282_v43  ;;  %v567_v5 = vpop.f32.mrb[6].mxu1 }
 0x20f   :  { %v385_v8 = vpop.f32.mrb[7].mxu1  ;;  %v394_v11 = vadd.f32 %v567_v5, %v297_v6  ;;  %v403_v14 = vmax.f32 %v391_v3, 0.0 }
 0x210   :  { %v462_v9 = vadd.f32 %v461_v2, %v455_v1  ;;  %v401_v10 = vmax.f32 %v383_v4, 0.0  ;;  %v386_v12 = vadd.f32 %v385_v8, %v287_v45 }
 0x211   :  { %v404_v19 = vmax.f32 %v394_v11, 0.0  ;;  %v459_v22 = vmul.f32 %v446_v21, %v403_v14 }
 0x212   :  { %v457_v15 = vmul.f32 %v436_v59, %v401_v10  ;;  %v463_v16 = vadd.f32 %v462_v9, %v456_v7  ;;  %v402_v17 = vmax.f32 %v386_v12, 0.0 }
 0x213   :  { %v460_v25 = vmul.f32 %v451_v24, %v404_v19 }
 0x214   :  { %v464_v18 = vadd.f32 %v463_v16, %v457_v15  ;;  %v458_v20 = vmul.f32 %v441_v13, %v402_v17 }
 0x216   :  { %v465_v23 = vadd.f32 %v464_v18, %v458_v20 }
 0x218   :  { %v466_v26 = vadd.f32 %v465_v23, %v459_v22 }
 0x21a   :  { %v467_v27 = vadd.f32 %v466_v26, %v460_v25 }
 0x21c   :  { %v468_v28 = vrot.slane %v467_v27, 4 }
 0x21e   :  { %v469_v29 = vadd.f32 %v468_v28, %v467_v27 }
 0x220   :  { %v470_v30 = vrot.slane %v469_v29, 2 }
 0x222   :  { %v471_v31 = vadd.f32 %v470_v30, %v469_v29 }
 0x224   :  { %v472_v32 = vrot.slane %v471_v31, 1 }
 0x226   :  { %v473_v34 = vadd.f32 %v472_v32, %v471_v31 }
 0x228   :  { %v476_v35 = vadd.f32 %v475_v33, %v473_v34 }
 0x22a   :  { %477 = vst [vmem:[#allocation3] sm:$0x1] %v476_v35 }
 0x22b   :  { %599 = shalt.err (!%p596_p4)
}
 0x22c   :  { %s600_s28 = scalar_lea.hbm %s844_s7, 16 }
 0x22d   :  { %p601_p5 = scmp.ne.s32.totalorder %s844_s7, %s600_s28  ;;  %p604_p6 = scmp.lt.u32.totalorder %s600_s28, %s844_s7 }
 0x22f   :  { %p606_p7 = pnand %p604_p6, %p601_p5 }
 0x231   :  { %609 = shalt.err (!%p606_p7)
}
 0x232   :  { %487 = dma.vmem_to_hbm [thread:$0]  %s485_s23, 16, %s844_s7, [#allocation4]  }
 0x233   :  { %610 = dma.done.wait [#allocation4], 16  }
 0x234   :  { %611 = vsyncadd [#allocation4], 4294967280 }
 0x235   :  { %491 = vsyncpa [#allocation4], 1 }

</bundles_post_ra>
